<compile_context>
chip_gen: v7x
topology: tpu7x:2x2x1
jax: 0.10.0
libtpu: 0.0.40
codegen_flags: <defaults>
</compile_context>

<pallas_src>
import math
import jax
import jax.numpy as jnp
from jax.experimental import pallas as pl
from jax.experimental.pallas import tpu as pltpu

HIDDEN1 = 150          # logical hidden sizes (match the PyTorch module)
HIDDEN2 = 120
LANE = 128
HIDDEN1_PAD = 256      # round_up(150, 128)
HIDDEN2_PAD = 128      # round_up(120, 128)
NEG_SLOPE = 0.01       # torch.nn.functional.leaky_relu default
MAX_BATCH_TILE = 256   # batch tile cap (multiple of 8)


def _round_up(n, m):
    return ((n + m - 1) // m) * m


def _leaky_relu(x):
    return jnp.where(x > 0, x, NEG_SLOPE * x)


def qnet_mlp_kernel(x_ref, w1_ref, b1_ref, w2_ref, b2_ref, w3_ref, b3_ref, o_ref):
    """Fused 3-layer MLP on one (TB, num_in) batch tile.

    Matmuls run in the weights' dtype (bf16 by default) with f32 accumulation;
    bias add + leaky_relu run in f32 on the accumulator.
    """
    wdt = w1_ref.dtype
    x = x_ref[...].astype(wdt)

    h1 = jnp.dot(x, w1_ref[...], preferred_element_type=jnp.float32) + b1_ref[...]
    h1 = _leaky_relu(h1)

    h2 = (jnp.dot(h1.astype(wdt), w2_ref[...], preferred_element_type=jnp.float32)
          + b2_ref[...])
    h2 = _leaky_relu(h2)

    o_ref[...] = (jnp.dot(h2.astype(wdt), w3_ref[...],
                          preferred_element_type=jnp.float32)
                  + b3_ref[...]).astype(o_ref.dtype)


def qnet_mlp_forward(x, params, num_a):
    """x: (B, num_in) float32; params from init_qnet_mlp_params; returns (B, num_a) f32."""
    w1, b1 = params["w1"], params["b1"]
    w2, b2 = params["w2"], params["b2"]
    w3, b3 = params["w3"], params["b3"]

    B, num_in = x.shape
    out_pad = w3.shape[1]                       # lane-padded action dim (>=128-multiple)

    # Batch tile: multiple of 8, capped at MAX_BATCH_TILE; pad batch to a tile
    # multiple so every grid block is full (padded rows are discarded below).
    tb = min(MAX_BATCH_TILE, _round_up(B, 8))
    b_pad = _round_up(B, tb)
    if b_pad != B:
        x = jnp.pad(x, ((0, b_pad - B), (0, 0)))
    grid = (b_pad // tb,)

    def resident(arr):
        # Full-array block, same tile every grid step -> stays VMEM-resident.
        return pl.BlockSpec(arr.shape, lambda i: (0, 0))

    out_padded = pl.pallas_call(
        qnet_mlp_kernel,
        out_shape=jax.ShapeDtypeStruct((b_pad, out_pad), jnp.float32),
        grid=grid,
        in_specs=[
            pl.BlockSpec((tb, num_in), lambda i: (i, 0)),   # x: tiled over batch
            resident(w1), resident(b1),
            resident(w2), resident(b2),
            resident(w3), resident(b3),
        ],
        out_specs=pl.BlockSpec((tb, out_pad), lambda i: (i, 0)),
        compiler_params=pltpu.CompilerParams(
            dimension_semantics=("parallel",)),              # megacore batch split (v7x)
    )(x, w1, b1, w2, b2, w3, b3)

    return out_padded[:B, :num_a]


def _xavier_uniform(key, fan_in, fan_out):
    # Matches nn.init.xavier_uniform_ (gain=1): U(-a, a), a = sqrt(6/(fan_in+fan_out)).
    a = math.sqrt(6.0 / (fan_in + fan_out))
    # Stored as (in, out) = transpose of PyTorch's (out, in); distribution symmetric.
    return jax.random.uniform(key, (fan_in, fan_out), jnp.float32, -a, a)


def _linear_bias(key, fan_in, fan_out):
    # PyTorch Linear default bias init: U(-1/sqrt(fan_in), 1/sqrt(fan_in)).
    bound = 1.0 / math.sqrt(fan_in)
    return jax.random.uniform(key, (1, fan_out), jnp.float32, -bound, bound)


def init_qnet_mlp_params(key, num_in, num_a, weight_dtype=jnp.bfloat16):
    """Init QNet_MLP params, zero-padded to lane-aligned (128-multiple) widths.

    Padded weight columns/rows and bias entries are exactly zero, so padded
    activation columns are exactly zero through leaky_relu and the padded
    output columns are sliced away in the wrapper -> numerics match the
    unpadded model exactly (up to the weight dtype).
    """
    k1, k2, k3, k4, k5, k6 = jax.random.split(key, 6)
    out_pad = _round_up(num_a, LANE)

    w1 = _xavier_uniform(k1, num_in, HIDDEN1)
    w2 = _xavier_uniform(k2, HIDDEN1, HIDDEN2)
    w3 = _xavier_uniform(k3, HIDDEN2, num_a)
    b1 = _linear_bias(k4, num_in, HIDDEN1)
    b2 = _linear_bias(k5, HIDDEN1, HIDDEN2)
    b3 = _linear_bias(k6, HIDDEN2, num_a)

    def pad_w(w, rows, cols):
        return (jnp.zeros((rows, cols), weight_dtype)
                .at[:w.shape[0], :w.shape[1]].set(w.astype(weight_dtype)))

    def pad_b(b, cols):
        return jnp.zeros((1, cols), jnp.float32).at[:, :b.shape[1]].set(b)

    return {
        "w1": pad_w(w1, num_in, HIDDEN1_PAD),
        "b1": pad_b(b1, HIDDEN1_PAD),
        "w2": pad_w(w2, HIDDEN1_PAD, HIDDEN2_PAD),
        "b2": pad_b(b2, HIDDEN2_PAD),
        "w3": pad_w(w3, HIDDEN2_PAD, out_pad),
        "b3": pad_b(b3, out_pad),
    }


def reference_forward(x, params, num_a):
    """Pure-JAX reference computing the same math (same padded bf16 weights)."""
    wdt = params["w1"].dtype
    h1 = (jnp.dot(x.astype(wdt), params["w1"], preferred_element_type=jnp.float32)
          + params["b1"])
    h1 = _leaky_relu(h1)
    h2 = (jnp.dot(h1.astype(wdt), params["w2"], preferred_element_type=jnp.float32)
          + params["b2"])
    h2 = _leaky_relu(h2)
    y = (jnp.dot(h2.astype(wdt), params["w3"], preferred_element_type=jnp.float32)
         + params["b3"])
    return y[:, :num_a]


if __name__ == "__main__":
    key = jax.random.PRNGKey(0)
    k_params, k_x = jax.random.split(key)

    # Small shapes consistent with the module: obs_shape=(16,) -> num_in=16,
    # num_a=4 actions, batch of 2 (already-flattened) observations.
    batch, num_in, num_a = 2, 16, 4
    params = init_qnet_mlp_params(k_params, num_in, num_a)
    x = jax.random.normal(k_x, (batch, num_in), jnp.float32)

    out = qnet_mlp_forward(x, params, num_a)
    out = jax.block_until_ready(out)

    ref = reference_forward(x, params, num_a)
    assert out.shape == (batch, num_a)
    assert jnp.allclose(out, ref, atol=1e-3, rtol=1e-3), (out, ref)

    print("KERNEL_OK")
</pallas_src>

<mosaic_0001>
module attributes {stable_mosaic.version = 11 : i64} {
  func.func @qnet_mlp_kernel(%arg0: i32, %arg1: memref<8x16xf32, #tpu.memory_space<vmem>>, %arg2: memref<16x256xbf16, #tpu.memory_space<vmem>>, %arg3: memref<1x256xf32, #tpu.memory_space<vmem>>, %arg4: memref<256x128xbf16, #tpu.memory_space<vmem>>, %arg5: memref<1x128xf32, #tpu.memory_space<vmem>>, %arg6: memref<128x128xbf16, #tpu.memory_space<vmem>>, %arg7: memref<1x128xf32, #tpu.memory_space<vmem>>, %arg8: memref<8x128xf32, #tpu.memory_space<vmem>>) attributes {dimension_semantics = [#tpu.dimension_semantics<parallel>], iteration_bounds = array<i64: 1>, scalar_prefetch = 0 : i64, scratch_operands = 0 : i64, tpu.core_type = #tpu.core_type<tc>, window_params = [{transform_indices = @transform_0, window_bounds = array<i64: 8, 16>}, {pipeline_mode = #tpu.pipeline_mode<synchronous>, transform_indices = @transform_1, window_bounds = array<i64: 16, 256>}, {pipeline_mode = #tpu.pipeline_mode<synchronous>, transform_indices = @transform_2, window_bounds = array<i64: 1, 256>}, {pipeline_mode = #tpu.pipeline_mode<synchronous>, transform_indices = @transform_3, window_bounds = array<i64: 256, 128>}, {pipeline_mode = #tpu.pipeline_mode<synchronous>, transform_indices = @transform_4, window_bounds = array<i64: 1, 128>}, {pipeline_mode = #tpu.pipeline_mode<synchronous>, transform_indices = @transform_5, window_bounds = array<i64: 128, 128>}, {pipeline_mode = #tpu.pipeline_mode<synchronous>, transform_indices = @transform_6, window_bounds = array<i64: 1, 128>}, {transform_indices = @transform_7, window_bounds = array<i64: 8, 128>}]} {
    %c0 = arith.constant 0 : index
    %c0_0 = arith.constant 0 : index
    %0 = vector.load %arg1[%c0, %c0_0] : memref<8x16xf32, #tpu.memory_space<vmem>>, vector<8x16xf32>
    %1 = arith.truncf %0 : vector<8x16xf32> to vector<8x16xbf16>
    %c0_1 = arith.constant 0 : index
    %c0_2 = arith.constant 0 : index
    %2 = vector.load %arg2[%c0_1, %c0_2] : memref<16x256xbf16, #tpu.memory_space<vmem>>, vector<16x256xbf16>
    %cst = arith.constant dense<0.000000e+00> : vector<8x256xf32>
    %3 = tpu.matmul %1, %2, %cst {dimension_numbers = #tpu.dot_dimension_numbers<[1], [0], [0], [1], [0, 0, 1, 1], [], []>} : vector<8x16xbf16>, vector<16x256xbf16>, vector<8x256xf32> -> vector<8x256xf32>
    %c0_3 = arith.constant 0 : index
    %c0_4 = arith.constant 0 : index
    %4 = vector.load %arg3[%c0_3, %c0_4] : memref<1x256xf32, #tpu.memory_space<vmem>>, vector<1x256xf32>
    %5 = vector.broadcast %4 : vector<1x256xf32> to vector<8x256xf32>
    %6 = arith.addf %3, %5 : vector<8x256xf32>
    %cst_5 = arith.constant 0.000000e+00 : f32
    %7 = vector.broadcast %cst_5 : f32 to vector<8x256xf32>
    %8 = arith.cmpf ogt, %6, %7 : vector<8x256xf32>
    %cst_6 = arith.constant 0.00999999977 : f32
    %9 = vector.broadcast %cst_6 : f32 to vector<8x256xf32>
    %10 = arith.mulf %9, %6 : vector<8x256xf32>
    %11 = arith.select %8, %6, %10 : vector<8x256xi1>, vector<8x256xf32>
    %12 = arith.truncf %11 : vector<8x256xf32> to vector<8x256xbf16>
    %c0_7 = arith.constant 0 : index
    %c0_8 = arith.constant 0 : index
    %13 = vector.load %arg4[%c0_7, %c0_8] : memref<256x128xbf16, #tpu.memory_space<vmem>>, vector<256x128xbf16>
    %cst_9 = arith.constant dense<0.000000e+00> : vector<8x128xf32>
    %14 = tpu.matmul %12, %13, %cst_9 {dimension_numbers = #tpu.dot_dimension_numbers<[1], [0], [0], [1], [0, 0, 1, 1], [], []>} : vector<8x256xbf16>, vector<256x128xbf16>, vector<8x128xf32> -> vector<8x128xf32>
    %c0_10 = arith.constant 0 : index
    %c0_11 = arith.constant 0 : index
    %15 = vector.load %arg5[%c0_10, %c0_11] : memref<1x128xf32, #tpu.memory_space<vmem>>, vector<1x128xf32>
    %16 = vector.broadcast %15 : vector<1x128xf32> to vector<8x128xf32>
    %17 = arith.addf %14, %16 : vector<8x128xf32>
    %cst_12 = arith.constant 0.000000e+00 : f32
    %18 = vector.broadcast %cst_12 : f32 to vector<8x128xf32>
    %19 = arith.cmpf ogt, %17, %18 : vector<8x128xf32>
    %cst_13 = arith.constant 0.00999999977 : f32
    %20 = vector.broadcast %cst_13 : f32 to vector<8x128xf32>
    %21 = arith.mulf %20, %17 : vector<8x128xf32>
    %22 = arith.select %19, %17, %21 : vector<8x128xi1>, vector<8x128xf32>
    %23 = arith.truncf %22 : vector<8x128xf32> to vector<8x128xbf16>
    %c0_14 = arith.constant 0 : index
    %c0_15 = arith.constant 0 : index
    %24 = vector.load %arg6[%c0_14, %c0_15] : memref<128x128xbf16, #tpu.memory_space<vmem>>, vector<128x128xbf16>
    %cst_16 = arith.constant dense<0.000000e+00> : vector<8x128xf32>
    %25 = tpu.matmul %23, %24, %cst_16 {dimension_numbers = #tpu.dot_dimension_numbers<[1], [0], [0], [1], [0, 0, 1, 1], [], []>} : vector<8x128xbf16>, vector<128x128xbf16>, vector<8x128xf32> -> vector<8x128xf32>
    %c0_17 = arith.constant 0 : index
    %c0_18 = arith.constant 0 : index
    %26 = vector.load %arg7[%c0_17, %c0_18] : memref<1x128xf32, #tpu.memory_space<vmem>>, vector<1x128xf32>
    %27 = vector.broadcast %26 : vector<1x128xf32> to vector<8x128xf32>
    %28 = arith.addf %25, %27 : vector<8x128xf32>
    %c0_19 = arith.constant 0 : index
    %c0_20 = arith.constant 0 : index
    %29 = vector.load %arg8[%c0_19, %c0_20] : memref<8x128xf32, #tpu.memory_space<vmem>>, vector<8x128xf32>
    tpu.vector_store %arg8[%c0_19, %c0_20], %28 {strides = array<i32>} : memref<8x128xf32, #tpu.memory_space<vmem>>, vector<8x128xf32>,
    return
  }
  func.func @transform_0(%arg0: i32) -> (i32, i32) {
    %c0_i32 = arith.constant 0 : i32
    %c0_i32_0 = arith.constant 0 : i32
    return %arg0, %c0_i32 : i32, i32
  }
  func.func @transform_1(%arg0: i32) -> (i32, i32) {
    %c0_i32 = arith.constant 0 : i32
    %c0_i32_0 = arith.constant 0 : i32
    %c0_i32_1 = arith.constant 0 : i32
    return %c0_i32, %c0_i32_0 : i32, i32
  }
  func.func @transform_2(%arg0: i32) -> (i32, i32) {
    %c0_i32 = arith.constant 0 : i32
    %c0_i32_0 = arith.constant 0 : i32
    %c0_i32_1 = arith.constant 0 : i32
    return %c0_i32, %c0_i32_0 : i32, i32
  }
  func.func @transform_3(%arg0: i32) -> (i32, i32) {
    %c0_i32 = arith.constant 0 : i32
    %c0_i32_0 = arith.constant 0 : i32
    %c0_i32_1 = arith.constant 0 : i32
    return %c0_i32, %c0_i32_0 : i32, i32
  }
  func.func @transform_4(%arg0: i32) -> (i32, i32) {
    %c0_i32 = arith.constant 0 : i32
    %c0_i32_0 = arith.constant 0 : i32
    %c0_i32_1 = arith.constant 0 : i32
    return %c0_i32, %c0_i32_0 : i32, i32
  }
  func.func @transform_5(%arg0: i32) -> (i32, i32) {
    %c0_i32 = arith.constant 0 : i32
    %c0_i32_0 = arith.constant 0 : i32
    %c0_i32_1 = arith.constant 0 : i32
    return %c0_i32, %c0_i32_0 : i32, i32
  }
  func.func @transform_6(%arg0: i32) -> (i32, i32) {
    %c0_i32 = arith.constant 0 : i32
    %c0_i32_0 = arith.constant 0 : i32
    %c0_i32_1 = arith.constant 0 : i32
    return %c0_i32, %c0_i32_0 : i32, i32
  }
  func.func @transform_7(%arg0: i32) -> (i32, i32) {
    %c0_i32 = arith.constant 0 : i32
    %c0_i32_0 = arith.constant 0 : i32
    return %arg0, %c0_i32 : i32, i32
  }
}

</mosaic_0001>

<bundles_post_ra>
// kernel: tpu_custom_call.1
= control target key start
LH: loop header
LB: loop body
LE: loop exit
PB: predicated region body
PF: predicated region fallthrough
CT: control target
= control target key end

     0   :  { %12 = vsyncpa [#allocation3], 0  ;;  %s826_s0 = inlined_call_operand.hbm [shape: f32[8,16], index: 0, kind: input, shape index: {}]   ;;  %s827_s1 = inlined_call_operand.hbm [shape: bf16[16,256], index: 1, kind: input, shape index: {}]   ;;  %s828_s2 = inlined_call_operand.vmem [shape: f32[1,256], index: 2, kind: input, shape index: {}]   ;;  %s829_s3 = inlined_call_operand.hbm [shape: bf16[256,128], index: 3, kind: input, shape index: {}]   ;;  %s830_s4 = inlined_call_operand.vmem [shape: f32[1,128], index: 4, kind: input, shape index: {}]   ;;  %s831_s5 = inlined_call_operand.hbm [shape: bf16[128,128], index: 5, kind: input, shape index: {}]   ;;  %s832_s6 = inlined_call_operand.vmem [shape: f32[1,128], index: 6, kind: input, shape index: {}]   ;;  %s833_s7 = inlined_call_operand.hbm [shape: f32[8,128], index: 7, kind: output, shape index: {}]  }
   0x1   :  { %13 = vsyncpa [#allocation6], 0 }
   0x2   :  { %14 = vsyncpa [#allocation9], 0 }
   0x3   :  { %15 = vsyncpa [#allocation4], 0  ;;  %s705_s24 = smov [#allocation5]   ;;  %s587_s28 = scalar_lea.hbm %s827_s1, 256 }
   0x4   :  { %s31_s25 = sshll.u32 %s705_s24, 4  ;;  %p588_p0 = scmp.ne.s32.totalorder %s827_s1, %s587_s28  ;;  %s32_s25 = int_to_ptr.vmem [resolvable:$true] %s31_s25 }
   0x5   :  { %p591_p1 = scmp.lt.u32.totalorder %s587_s28, %s827_s1 }
   0x7   :  { %p593_p2 = pnand %p591_p1, %p588_p0 }
   0x9   :  { %596 = shalt.err (!%p593_p2)
}
   0xa   :  { %s597_s10 = scalar_lea.vmem %s32_s25, 256  ;;  %p602_p4 = scmp.lt.s32.totalorder %s32_s25, %s32_s25 }
   0xb   :  { %p598_p3 = scmp.ne.s32.totalorder %s32_s25, %s597_s10  ;;  %p603_p5 = scmp.lt.s32.totalorder %s597_s10, %s597_s10 }
   0xd   :  { %p604_p6 = por %p603_p5, %p602_p4 }
   0xf   :  { %p605_p7 = pnand %p604_p6, %p598_p3 }
  0x11   :  { %608 = shalt.err (!%p605_p7)
}
  0x12   :  { %s706_s11 = smov 128   ;;  %s707_s12 = smov 8  }
  0x13   :  { %37 = dma.hbm_to_vmem [thread:$0]  %s827_s1, 256, %s32_s25, [#allocation6], %s706_s11, %s706_s11, %s707_s12  }
  0x14   :  { %s708_s15 = smov [#allocation2]   ;;  %s709_s17 = smov [#allocation7]  }
  0x15   :  { %s22_s16 = sshll.u32 %s708_s15, 4  ;;  %s45_s18 = sshll.u32 %s709_s17, 4  ;;  %s23_s16 = int_to_ptr.vmem [resolvable:$true] %s22_s16  ;;  %s46_s18 = int_to_ptr.vmem [resolvable:$true] %s45_s18 }
  0x16   :  { %s609_s21 = scalar_lea.hbm %s826_s0, 128 }
  0x17   :  { %p610_p8 = scmp.ne.s32.totalorder %s826_s0, %s609_s21  ;;  %p613_p9 = scmp.lt.u32.totalorder %s609_s21, %s826_s0 }
  0x19   :  { %p615_p10 = pnand %p613_p9, %p610_p8 }
  0x1b   :  { %618 = shalt.err (!%p615_p10)
}
  0x1c   :  { %s619_s1 = scalar_lea.vmem %s23_s16, 128  ;;  %p624_p12 = scmp.lt.s32.totalorder %s23_s16, %s23_s16 }
  0x1d   :  { %p620_p11 = scmp.ne.s32.totalorder %s23_s16, %s619_s1  ;;  %p625_p13 = scmp.lt.s32.totalorder %s619_s1, %s619_s1 }
  0x1f   :  { %p626_p0 = por %p625_p13, %p624_p12 }
  0x21   :  { %p627_p1 = pnand %p626_p0, %p620_p11 }
  0x23   :  { %630 = shalt.err (!%p627_p1)
}
  0x24   :  { %25 = dma.hbm_to_vmem [thread:$0]  %s826_s0, 128, %s23_s16, [#allocation3]  }
  0x25   :  { %s631_s30 = scalar_lea.hbm %s829_s3, 2048 }
  0x26   :  { %p632_p2 = scmp.ne.s32.totalorder %s829_s3, %s631_s30  ;;  %p635_p3 = scmp.lt.u32.totalorder %s631_s30, %s829_s3 }
  0x28   :  { %p637_p4 = pnand %p635_p3, %p632_p2 }
  0x2a   :  { %640 = shalt.err (!%p637_p4)
}
  0x2b   :  { %s641_s12 = scalar_lea.vmem %s46_s18, 2048  ;;  %p646_p6 = scmp.lt.s32.totalorder %s46_s18, %s46_s18 }
  0x2c   :  { %p642_p5 = scmp.ne.s32.totalorder %s46_s18, %s641_s12  ;;  %p647_p7 = scmp.lt.s32.totalorder %s641_s12, %s641_s12 }
  0x2e   :  { %p648_p8 = por %p647_p7, %p646_p6 }
  0x30   :  { %p649_p9 = pnand %p648_p8, %p642_p5 }
  0x32   :  { %652 = shalt.err (!%p649_p9)
}
  0x33   :  { %s710_s0 = smov 64   ;;  %s711_s13 = smov 4  }
  0x34   :  { %51 = dma.hbm_to_vmem [thread:$0]  %s829_s3, 2048, %s46_s18, [#allocation6], %s710_s0, %s710_s0, %s711_s13  }
  0x35   :  { %s712_s16 = smov [#allocation8]   ;;  %s653_s21 = scalar_lea.hbm %s831_s5, 1024 }
  0x36   :  { %s59_s17 = sshll.u32 %s712_s16, 4  ;;  %p654_p10 = scmp.ne.s32.totalorder %s831_s5, %s653_s21  ;;  %s60_s17 = int_to_ptr.vmem [resolvable:$true] %s59_s17 }
  0x37   :  { %p657_p11 = scmp.lt.u32.totalorder %s653_s21, %s831_s5 }
  0x39   :  { %p659_p12 = pnand %p657_p11, %p654_p10 }
  0x3b   :  { %662 = shalt.err (!%p659_p12)
}
  0x3c   :  { %s663_s1 = scalar_lea.vmem %s60_s17, 1024  ;;  %p668_p0 = scmp.lt.s32.totalorder %s60_s17, %s60_s17 }
  0x3d   :  { %p664_p13 = scmp.ne.s32.totalorder %s60_s17, %s663_s1  ;;  %p669_p1 = scmp.lt.s32.totalorder %s663_s1, %s663_s1 }
  0x3f   :  { %p670_p2 = por %p669_p1, %p668_p0 }
  0x41   :  { %p671_p3 = pnand %p670_p2, %p664_p13 }
  0x43   :  { %674 = shalt.err (!%p671_p3)
}
  0x44   :  { %65 = dma.hbm_to_vmem [thread:$0]  %s831_s5, 1024, %s60_s17, [#allocation9], %s710_s0, %s710_s0, %s711_s13  }
  0x45   :  { %697 = dma.done.wait [#allocation3], 128  }
  0x46   :  { %698 = vsyncadd [#allocation3], 4294967168 }
  0x47   :  { %699 = dma.done.wait [#allocation6], 2304  }
  0x48   :  { %700 = vsyncadd [#allocation6], 4294964992 }
  0x49   :  { %701 = dma.done.wait [#allocation9], 1024  }
  0x4a   :  { %702 = vsyncadd [#allocation9], 4294966272  ;;  %v713_v0 = vmov 0   ;;  %v560_v1 = vld [vmem:[#allocation5 + $0x4] ss:$8 sps:$4 sm:$0xff]   ;;  %v81_v3 = vld [vmem:[#allocation2] sm:$0xff]  ;;  %v87_v27 = vlaneseq }
  0x4b   :  { %143 = vmatprep.mubr.bf16.mxu0 %v713_v0  ;;  %v562_v2 = vld [vmem:[#allocation5] ss:$8 sps:$4 sm:$0xff]   ;;  %111 = vmatprep.subr.bf16.mxu0 %v560_v1  ;;  %v82_v4 = vpack.c.bf16 %v81_v3, %v81_v3  ;;  %v563_v5 = vld [vmem:[#allocation7 + $0x40] sm:$0xff]   ;;  %vm107_vm0 = vcmask 130048   ;;  %v565_v7 = vld [vmem:[#allocation7 + $0x48] sm:$0xff]   ;;  %v714_v22 = vmov 0.0  }
  0x4c   :  { %112 = vmatpush1.bf16.msra.mxu0 %v562_v2  ;;  %v564_v6 = vld [vmem:[#allocation7] sm:$0xff]   ;;  %497 = vmatprep.subr.bf16.mxu1 %v563_v5  ;;  %v566_v8 = vld [vmem:[#allocation7 + $0x8] sm:$0xff]   ;;  %v567_v9 = vld [vmem:[#allocation7 + $0x50] sm:$0xff]   ;;  %v88_v28 = vshrl.u32 %v87_v27, 7  ;;  %vm715_vm3 = vmmov 0   ;;  %s716_s30 = smov [#allocation10]  }
  0x4d   :  { %498 = vmatpush3.bf16.msra.mxu1 %v564_v6  ;;  %v568_v10 = vld [vmem:[#allocation7 + $0x10] sm:$0xff]   ;;  %v569_v11 = vld [vmem:[#allocation7 + $0x58] sm:$0xff]   ;;  %v571_v13 = vld [vmem:[#allocation7 + $0x60] sm:$0xff]   ;;  %528 = vmatprep.subr.bf16.mxu0 %v714_v22  ;;  %s457_s8 = sshll.u32 %s716_s30, 4  ;;  %s458_s8 = int_to_ptr.vmem [resolvable:$true] %s457_s8 }
  0x4e   :  { %499 = vmatprep.subr.bf16.mxu1 %v565_v7  ;;  %v570_v12 = vld [vmem:[#allocation7 + $0x18] sm:$0xff]   ;;  %v572_v14 = vld [vmem:[#allocation7 + $0x20] sm:$0xff]   ;;  %v573_v15 = vld [vmem:[#allocation7 + $0x68] sm:$0xff]   ;;  %v89_v29 = vsub.s32 0, %v88_v28  ;;  %v93_v31 = vsub.s32 1, %v88_v28  ;;  %p680_p5 = scmp.lt.s32.totalorder %s458_s8, %s458_s8 }
  0x4f   :  { %470 = vmatmul.mubr.msk.bf16.vlgmr.msra.gmra.mrb[0].mxu0 %vm107_vm0, %v82_v4  ;;  %v574_v16 = vld [vmem:[#allocation7 + $0x28] sm:$0xff]   ;;  %v575_v17 = vld [vmem:[#allocation7 + $0x70] sm:$0xff]   ;;  %v577_v19 = vld [vmem:[#allocation7 + $0x78] sm:$0xff]  }
  0x50   :  { %v576_v18 = vld [vmem:[#allocation7 + $0x30] sm:$0xff]   ;;  %v578_v20 = vld [vmem:[#allocation7 + $0x38] sm:$0xff]   ;;  %v579_v21 = vld [vmem:[#allocation8] sm:$0xff]   ;;  %544 = vmatprep.mubr.msk.bf16.mxu0 %vm715_vm3, %v714_v22 }
  0x51   :  { %500 = vmatpush3.bf16.msra.mxu1 %v566_v8  ;;  %529 = vmatpush3.bf16.msra.mxu0 %v579_v21  ;;  %v580_v23 = vld [vmem:[#allocation8 + $0x8] sm:$0xff]   ;;  %v581_v24 = vld [vmem:[#allocation8 + $0x10] sm:$0xff]   ;;  %v582_v25 = vld [vmem:[#allocation8 + $0x18] sm:$0xff]  }
  0x52   :  { %501 = vmatprep.subr.bf16.mxu1 %v567_v9  ;;  %530 = vmatprep.subr.bf16.mxu0 %v714_v22  ;;  %v583_v26 = vld [vmem:[#allocation8 + $0x20] sm:$0xff]   ;;  %v85_v30 = vld [vmem:[%s828_s2] sm:$0x3]  ;;  %v585_v47 = vld [vmem:[#allocation8 + $0x30] sm:$0xff]  }
  0x53   :  { %v90_v32 = vrot.slane %v85_v30, %v89_v29  ;;  %v94_v33 = vrot.slane %v85_v30, %v93_v31  ;;  %v584_v46 = vld [vmem:[#allocation8 + $0x28] sm:$0xff]   ;;  %v586_v48 = vld [vmem:[#allocation8 + $0x38] sm:$0xff]  }
  0x54   :  { %v471_v50 = vld [vmem:[%s830_s4] ss:$0 sm:$0xff]  ;;  %s675_s4 = scalar_lea.vmem %s458_s8, 128 }
  0x55   :  { %502 = vmatpush3.bf16.msra.mxu1 %v568_v10  ;;  %531 = vmatpush3.bf16.msra.mxu0 %v580_v23  ;;  %v488_v59 = vld [vmem:[%s832_s6] ss:$0 sm:$0xff]  ;;  %p676_p4 = scmp.ne.s32.totalorder %s458_s8, %s675_s4  ;;  %p681_p6 = scmp.lt.s32.totalorder %s675_s4, %s675_s4 }
  0x56   :  { %503 = vmatprep.subr.bf16.mxu1 %v569_v11  ;;  %532 = vmatprep.subr.bf16.mxu0 %v714_v22 }
  0x57   :  { %p682_p7 = por %p681_p6, %p680_p5 }
  0x59   :  { %504 = vmatpush3.bf16.msra.mxu1 %v570_v12  ;;  %533 = vmatpush3.bf16.msra.mxu0 %v581_v24  ;;  %p683_p8 = pnand %p682_p7, %p676_p4 }
  0x5a   :  { %505 = vmatprep.subr.bf16.mxu1 %v571_v13  ;;  %534 = vmatprep.subr.bf16.mxu0 %v714_v22 }
  0x5d   :  { %506 = vmatpush3.bf16.msra.mxu1 %v572_v14  ;;  %535 = vmatpush3.bf16.msra.mxu0 %v582_v25 }
  0x5e   :  { %507 = vmatprep.subr.bf16.mxu1 %v573_v15  ;;  %536 = vmatprep.subr.bf16.mxu0 %v714_v22 }
  0x61   :  { %508 = vmatpush3.bf16.msra.mxu1 %v574_v16  ;;  %537 = vmatpush3.bf16.msra.mxu0 %v583_v26 }
  0x62   :  { %509 = vmatprep.subr.bf16.mxu1 %v575_v17  ;;  %538 = vmatprep.subr.bf16.mxu0 %v714_v22 }
  0x65   :  { %510 = vmatpush3.bf16.msra.mxu1 %v576_v18  ;;  %539 = vmatpush3.bf16.msra.mxu0 %v584_v46 }
  0x66   :  { %511 = vmatprep.subr.bf16.mxu1 %v577_v19  ;;  %540 = vmatprep.subr.bf16.mxu0 %v714_v22 }
  0x69   :  { %512 = vmatpush3.bf16.msra.mxu1 %v578_v20  ;;  %541 = vmatpush3.bf16.msra.mxu0 %v585_v47 }
  0x6a   :  { %542 = vmatprep.subr.bf16.mxu0 %v714_v22 }
  0x6d   :  { %543 = vmatpush3.bf16.msra.mxu0 %v586_v48 }
 0x122   :  { %v145_v34 = vpop.f32.mrb[0].mxu0 }
 0x123   :  { %v146_v35 = vadd.f32 %v145_v34, %v90_v32  ;;  %v147_v36 = vpop.f32.mrb[1].mxu0 }
 0x124   :  { %v148_v37 = vadd.f32 %v147_v36, %v94_v33  ;;  %v149_v38 = vpop.f32.mrb[2].mxu0 }
 0x125   :  { %vm152_vm1 = vcmp.gt.f32.partialorder %v146_v35, 0.0  ;;  %v154_v39 = vmul.f32 0.01, %v146_v35  ;;  %v150_v40 = vpop.f32.mrb[3].mxu0 }
 0x126   :  { %vm153_vm2 = vcmp.gt.f32.partialorder %v148_v37, 0.0  ;;  %v155_v41 = vmul.f32 0.01, %v148_v37 }
 0x127   :  { %v156_v42 = vsel %vm152_vm1, %v146_v35, %v154_v39 }
 0x128   :  { %v157_v43 = vsel %vm153_vm2, %v148_v37, %v155_v41  ;;  %v158_v45 = vpack.c.bf16 %v156_v42, %v156_v42 }
 0x129   :  { %v159_v44 = vpack.c.bf16 %v157_v43, %v157_v43 }
 0x12b   :  { %327 = vmatprep.mubr.bf16.mxu1 %v159_v44 }
 0x12c   :  { %328 = vmatmul.mubr.bf16.vlgmr.msra.gmra.mrb[0].mxu1 %v158_v45 }
 0x1ff   :  { %v513_v49 = vpop.f32.mrb[0].mxu1 }
 0x200   :  { %v514_v51 = vpop.f32.mrb[1].mxu1 }
 0x201   :  { %v515_v52 = vadd.f32 %v514_v51, %v513_v49  ;;  %v516_v53 = vpop.f32.mrb[2].mxu1 }
 0x202   :  { %v517_v54 = vpop.f32.mrb[3].mxu1 }
 0x203   :  { %v330_v55 = vadd.f32 %v515_v52, %v471_v50 }
 0x205   :  { %vm335_vm4 = vcmp.gt.f32.partialorder %v330_v55, 0.0  ;;  %v336_v56 = vmul.f32 0.01, %v330_v55 }
 0x207   :  { %v337_v57 = vsel %vm335_vm4, %v330_v55, %v336_v56 }
 0x208   :  { %v338_v58 = vpack.c.bf16 %v337_v57, %v337_v57 }
 0x20a   :  { %545 = vmatmul.mubr.bf16.vlgmr.msra.gmra.mrb[4].mxu0 %v338_v58 }
 0x2dd   :  { %v444_v60 = vpop.f32.mrb[4].mxu0 }
 0x2de   :  { %v445_v61 = vadd.f32 %v488_v59, %v444_v60  ;;  %v546_v62 = vpop.f32.mrb[5].mxu0 }
 0x2df   :  { %v447_v63 = vpop.f32.mrb[6].mxu0 }
 0x2e0   :  { %450 = vst [vmem:[#allocation10] sm:$0xff] %v445_v61  ;;  %v547_v0 = vpop.f32.mrb[7].mxu0 }
 0x2e1   :  { %686 = shalt.err (!%p683_p8)
}
 0x2e2   :  { %s687_s6 = scalar_lea.hbm %s833_s7, 128 }
 0x2e3   :  { %p688_p9 = scmp.ne.s32.totalorder %s833_s7, %s687_s6  ;;  %p691_p10 = scmp.lt.u32.totalorder %s687_s6, %s833_s7 }
 0x2e5   :  { %p693_p11 = pnand %p691_p10, %p688_p9 }
 0x2e7   :  { %696 = shalt.err (!%p693_p11)
}
 0x2e8   :  { %460 = dma.vmem_to_hbm [thread:$0]  %s458_s8, 128, %s833_s7, [#allocation4]  }
 0x2e9   :  { %703 = dma.done.wait [#allocation4], 128  }
 0x2ea   :  { %704 = vsyncadd [#allocation4], 4294967168 }
 0x2eb   :  { %464 = vsyncpa [#allocation3], 1 }
 0x2ec   :  { %465 = vsyncpa [#allocation6], 1 }
 0x2ed   :  { %466 = vsyncpa [#allocation9], 1 }
 0x2ee   :  { %467 = vsyncpa [#allocation4], 1 }

</bundles_post_ra>
